<compile_context>
chip_gen: v7x
topology: tpu7x:2x2x1
jax: 0.10.0
libtpu: 0.0.40
codegen_flags: <defaults>
</compile_context>

<pallas_src>
import jax
import jax.numpy as jnp
from jax.experimental import pallas as pl
from jax.experimental.pallas import tpu as pltpu

# Input-tile byte budget per grid step. Pipelined VMEM footprint is ~6x this
# (double-buffered input + double-buffered 2x-sized output) ~= 24 MiB, which
# fits the explicit 32 MiB scoped-VMEM limit below on every TPU generation.
_TARGET_TILE_BYTES = 4 * 1024 * 1024
_VMEM_LIMIT_BYTES = 32 * 1024 * 1024


def _round_down(v, m):
    return (v // m) * m


def _choose_tiles(B, C, HW, itemsize):
    """Pick (tb, tc, tl) so each input block is ~_TARGET_TILE_BYTES."""
    # Native sublane packing: 8 rows (f32), 16 (bf16/f16), 32 (int8/fp8).
    sub = 8 if itemsize >= 4 else (16 if itemsize == 2 else 32)
    target = _TARGET_TILE_BYTES
    min_c = C if C < sub else sub

    # Lane tile: prefer full H*W (contiguous bursts, fewest DMA descriptors);
    # only split it when even a minimal channel strip exceeds the budget.
    if min_c * HW * itemsize <= target:
        tl = HW
    else:
        tl = min(HW, max(128, _round_down(target // (min_c * itemsize), 128)))

    # Channel tile: derived from the byte budget (no hard-coded cap). A full-C
    # block is only taken when it actually fits the budget (VMEM guard).
    if C * tl * itemsize <= target:
        tc = C
    else:
        tc = min(C, max(sub, _round_down(target // (tl * itemsize), sub)))

    # Batch tile: merge batches into one block when the per-batch slab is
    # small, turning many tiny grid steps into a few large contiguous DMAs.
    if tc == C and tl == HW:
        tb = max(1, min(B, target // max(C * HW * itemsize, 1)))
    else:
        tb = 1

    # v7x megacore: keep >= 2 steps along a 'parallel' axis when it is a clean
    # split (otherwise one TensorCore sits idle on a 1-step grid).
    if pl.cdiv(B, tb) * pl.cdiv(C, tc) * pl.cdiv(HW, tl) == 1:
        if B >= 2 and B % 2 == 0:
            tb = B // 2
        elif C % (2 * sub) == 0:
            tc = C // 2

    return tb, tc, tl


def add_inverse_kernel(x_ref, o_ref):
    # x_ref: (tb, tc, tl) VMEM tile;  o_ref: (tb, 2, tc, tl) VMEM tile.
    x = x_ref[...]
    o_ref[:, 0, :, :] = x
    o_ref[:, 1, :, :] = jnp.asarray(1, dtype=x.dtype) - x


def add_inverse(x):
    """Concatenate [x, 1 - x] along the channel axis (dim=-3, NCHW)."""
    squeeze = x.ndim == 3
    if squeeze:  # single image [C, H, W]
        x = x[None]
    B, C, H, W = x.shape
    HW = H * W
    itemsize = jnp.dtype(x.dtype).itemsize

    # Lane-dense flattened input; the (B, 2, C, HW) output has the same
    # contiguous memory layout as (B, 2C, H, W), so the final reshape is free.
    x2 = x.reshape(B, C, HW)

    tb, tc, tl = _choose_tiles(B, C, HW, itemsize)
    grid = (pl.cdiv(B, tb), pl.cdiv(C, tc), pl.cdiv(HW, tl))

    out = pl.pallas_call(
        add_inverse_kernel,
        out_shape=jax.ShapeDtypeStruct((B, 2, C, HW), x.dtype),
        grid_spec=pltpu.PrefetchScalarGridSpec(
            num_scalar_prefetch=0,
            grid=grid,
            in_specs=[pl.BlockSpec((tb, tc, tl), lambda b, i, j: (b, i, j))],
            out_specs=pl.BlockSpec((tb, 2, tc, tl), lambda b, i, j: (b, 0, i, j)),
        ),
        compiler_params=pltpu.CompilerParams(
            dimension_semantics=("parallel", "parallel", "parallel"),
            vmem_limit_bytes=_VMEM_LIMIT_BYTES,
        ),
    )(x2)

    out = out.reshape(B, 2 * C, H, W)
    if squeeze:
        out = out[0]
    return out


if __name__ == "__main__":
    key = jax.random.PRNGKey(0)
    x = jax.random.uniform(key, (2, 4, 16, 16), dtype=jnp.float32)

    # Batched 4-D path.
    y = add_inverse(x)
    jax.block_until_ready(y)
    y_ref = jnp.concatenate([x, 1.0 - x], axis=-3)
    assert y.shape == (2, 8, 16, 16)
    assert jnp.allclose(y, y_ref), "mismatch vs reference (4-D path)"

    # Single-image 3-D path.
    x3 = x[0]
    y3 = add_inverse(x3)
    jax.block_until_ready(y3)
    y3_ref = jnp.concatenate([x3, 1.0 - x3], axis=-3)
    assert y3.shape == (8, 16, 16)
    assert jnp.allclose(y3, y3_ref), "mismatch vs reference (3-D path)"

    print("KERNEL_OK")
</pallas_src>

<mosaic_0001>
module attributes {stable_mosaic.version = 11 : i64} {
  func.func @add_inverse_kernel(%arg0: i32, %arg1: i32, %arg2: i32, %arg3: memref<1x4x256xf32, #tpu.memory_space<vmem>>, %arg4: memref<1x2x4x256xf32, #tpu.memory_space<vmem>>) attributes {dimension_semantics = [#tpu.dimension_semantics<parallel>, #tpu.dimension_semantics<parallel>, #tpu.dimension_semantics<parallel>], iteration_bounds = array<i64: 2, 1, 1>, scalar_prefetch = 0 : i64, scratch_operands = 0 : i64, tpu.core_type = #tpu.core_type<tc>, window_params = [{transform_indices = @transform_0, window_bounds = array<i64: 1, 4, 256>}, {transform_indices = @transform_1, window_bounds = array<i64: 1, 2, 4, 256>}]} {
    %c0 = arith.constant 0 : index
    %c0_0 = arith.constant 0 : index
    %c0_1 = arith.constant 0 : index
    %0 = vector.load %arg3[%c0, %c0_0, %c0_1] : memref<1x4x256xf32, #tpu.memory_space<vmem>>, vector<1x4x256xf32>
    %c0_2 = arith.constant 0 : index
    %c0_3 = arith.constant 0 : index
    %c0_4 = arith.constant 0 : index
    %c0_5 = arith.constant 0 : index
    %1 = vector.load %arg4[%c0_2, %c0_3, %c0_4, %c0_5] : memref<1x2x4x256xf32, #tpu.memory_space<vmem>>, vector<1x1x4x256xf32>
    %2 = vector.shape_cast %1 : vector<1x1x4x256xf32> to vector<1x4x256xf32>
    %3 = vector.shape_cast %0 : vector<1x4x256xf32> to vector<1x1x4x256xf32>
    tpu.vector_store %arg4[%c0_2, %c0_3, %c0_4, %c0_5], %3 {strides = array<i32>} : memref<1x2x4x256xf32, #tpu.memory_space<vmem>>, vector<1x1x4x256xf32>,
    %cst = arith.constant 1.000000e+00 : f32
    %4 = vector.broadcast %cst : f32 to vector<1x4x256xf32>
    %5 = arith.subf %4, %0 : vector<1x4x256xf32>
    %c0_6 = arith.constant 0 : index
    %c1 = arith.constant 1 : index
    %c0_7 = arith.constant 0 : index
    %c0_8 = arith.constant 0 : index
    %6 = vector.load %arg4[%c0_6, %c1, %c0_7, %c0_8] : memref<1x2x4x256xf32, #tpu.memory_space<vmem>>, vector<1x1x4x256xf32>
    %7 = vector.shape_cast %6 : vector<1x1x4x256xf32> to vector<1x4x256xf32>
    %8 = vector.shape_cast %5 : vector<1x4x256xf32> to vector<1x1x4x256xf32>
    tpu.vector_store %arg4[%c0_6, %c1, %c0_7, %c0_8], %8 {strides = array<i32>} : memref<1x2x4x256xf32, #tpu.memory_space<vmem>>, vector<1x1x4x256xf32>,
    return
  }
  func.func @transform_0(%arg0: i32, %arg1: i32, %arg2: i32) -> (i32, i32, i32) {
    %c0_i32 = arith.constant 0 : i32
    return %arg0, %arg1, %arg2 : i32, i32, i32
  }
  func.func @transform_1(%arg0: i32, %arg1: i32, %arg2: i32) -> (i32, i32, i32, i32) {
    %c0_i32 = arith.constant 0 : i32
    %c0_i32_0 = arith.constant 0 : i32
    return %arg0, %c0_i32, %arg1, %arg2 : i32, i32, i32, i32
  }
}

</mosaic_0001>

<bundles_post_ra>
// kernel: tpu_custom_call.1
= control target key start
LH: loop header
LB: loop body
LE: loop exit
PB: predicated region body
PF: predicated region fallthrough
CT: control target
= control target key end

     0   :  { %6 = vsyncpa [#allocation3], 0  ;;  %s668_s0 = inlined_call_operand.hbm [shape: f32[2,4,256], index: 0, kind: input, shape index: {}]   ;;  %s669_s1 = inlined_call_operand.hbm [shape: f32[2,2,4,256], index: 1, kind: output, shape index: {}]  }
   0x1   :  { %8 = vsyncpa [#allocation3 + $0x1], 0 }
   0x2   :  { %9 = vsyncpa [#allocation4], 0 }
   0x3   :  { %11 = vsyncpa [#allocation4 + $0x1], 0  ;;  %s493_s6 = smov 0   ;;  %s495_s7 = smov 0  }
   0x4   :  { %s497_s8 = smov 0   ;;  %s499_s9 = smov 0  }
   0x5   :  { %s501_s10 = smov 0   ;;  %s503_s11 = smov 0  }
   0x6 LB: > { %s283_s12 = sadd.s32 4294967295, %s477_s11   ;;  %s284_s13 = sadd.s32 4294967294, %s477_s11   ;;  %s477_s11 = sphi %s503_s11, %s17_s11   ;;  %s473_s10 = sphi %s501_s10, %s685_s10   ;;  %s469_s9 = sphi %s499_s9, %s684_s9   ;;  %s465_s8 = sphi %s497_s8, %s683_s8   ;;  %s461_s7 = sphi %s495_s7, %s682_s7   ;;  %s457_s6 = sphi %s493_s6, %s681_s6  }
   0x7   : > { %s36_s14 = sadd.s32 1, %s473_s10  ;;  %s47_s15 = sadd.s32 1, %s465_s8 }
   0x8   : > { %p38_p0 = scmp.ge.s32.totalorder %s36_s14, 2  ;;  %p54_p1 = scmp.ne.s32.totalorder %s465_s8, %s461_s7 }
   0x9   : > { %p55_p2 = scmp.eq.s32.totalorder %s477_s11, 0  ;;  %p60_p3 = scmp.ne.s32.totalorder %s461_s7, %s457_s6 }
   0xa   : > { %s687_s14 = smov (%p38_p0, %s36_s14), 0  ;;  %p61_p5 = scmp.eq.s32.totalorder %s283_s12, 0 }
   0xb   : > { %p534_p4 = por %p55_p2, %p54_p1  ;;  %s40_s17 = ssub.s32 %s473_s10, %s687_s14 }
   0xc   : > { %p88_p6 = scmp.eq.s32.totalorder %s283_s12, 1  ;;  %p45_p7 = scmp.eq.s32.totalorder %s40_s17, 0 }
   0xd   : > { %p540_p8 = por %p61_p5, %p60_p3  ;;  %p94_p10 = scmp.eq.s32.totalorder %s284_s13, 1 }
   0xe   : > { %p544_p9 = por %p88_p6, %p54_p1  ;;  %p313_p13 = scmp.lt.s32.totalorder %s477_s11, 2 }
   0xf   : > { %s549_s20 = scalar_select %p45_p7, %s465_s8, %s47_s15  }
  0x10   : > { %s673_s19 = scalar_select %p544_p9, 1, 0 }
  0x11   : > { %p551_p11 = por %p94_p10, %p60_p3  ;;  %s114_s22 = sand.u32 1, %s465_s8  }
  0x12   : > { %s287_s23 = sshll.u32 %s114_s22, 3  ;;  %s299_s24 = sshll.u32 %s473_s10, 7 }
  0x13   : > { %s674_s21 = scalar_select %p551_p11, 1, 0 }
  0x14   : > { %s562_s27 = scalar_lea.hbm %s668_s0, %s299_s24  ;;  %s118_s28 = scalar_lea.vmem [#allocation2], %s287_s23 }
  0x15   : > { %s130_s29 = sshll.u32 %s118_s28, 4  ;;  %p568_p0 = pnand %p313_p13, %p534_p4  ;;  %s564_s29 = int_to_ptr.vmem [resolvable:$true] %s130_s29 }
  0x16   : > { %s115_s2 = scalar_lea.sflag [#allocation3], %s114_s22  ;;  %s365_s3 = scalar_lea.hbm %s562_s27, 128 }
  0x17   : > { %p366_p3 = scmp.ne.s32.totalorder %s562_s27, %s365_s3  ;;  %p367_p5 = pneg %p568_p0 }
  0x18   : > { %s370_s12 = scalar_lea.hbm %s668_s0, 256  ;;  %p371_p4 = scmp.lt.u32.totalorder %s562_s27, %s668_s0 }
  0x19   : > { %p368_p6 = pnand %p367_p5, %p366_p3  ;;  %p372_p10 = scmp.lt.u32.totalorder %s370_s12, %s365_s3 }
  0x1a   : > { %p374_p12 = scmp.lt.u32.totalorder %s365_s3, %s562_s27 }
  0x1b   : > { %p369_p7 = pneg %p368_p6  ;;  %p373_p13 = por %p372_p10, %p371_p4 }
  0x1d   : > { %p375_p1 = por %p374_p12, %p373_p13 }
  0x1f   : > { %p376_p2 = pnand %p375_p1, %p369_p7 }
  0x21   : > { %379 = shalt.err (!%p376_p2)
}
  0x22   : > { %s380_s16 = scalar_lea.vmem %s564_s29, 128  ;;  %s479_s17 = smov [#allocation2]  }
  0x23   : > { %p381_p3 = scmp.ne.s32.totalorder %s564_s29, %s380_s16  ;;  %s385_s22 = sshll.u32 %s479_s17, 4  ;;  %s386_s22 = int_to_ptr.vmem [resolvable:$false] %s385_s22 }
  0x24   : > { %s387_s23 = scalar_lea.vmem %s386_s22, 256  ;;  %p388_p9 = scmp.lt.s32.totalorder %s564_s29, %s386_s22 }
  0x25   : > { %p383_p6 = pnand %p381_p3, %p367_p5  ;;  %p389_p4 = scmp.lt.s32.totalorder %s387_s23, %s380_s16 }
  0x27   : > { %p384_p11 = pneg %p383_p6  ;;  %p390_p10 = por %p389_p4, %p388_p9 }
  0x29   : > { %p391_p12 = pnand %p390_p10, %p384_p11 }
  0x2b   : > { %394 = shalt.err (!%p391_p12)
}
  0x2c   : > { %308 = dma.hbm_to_vmem [thread:$0]  (!%p568_p0), %s562_s27, 128, %s564_s29, %s115_s2  }
  0x2d   : > { %p676_p1 = scmp.lt.s32.totalorder %s477_s11, 3  ;;  %p677_p2 = scmp.ge.s32.totalorder %s477_s11, 1 }
  0x2f   : > { %p136_p5 = pnand %p677_p2, %p676_p1 }
  0x30   : > { %s604_s24 = sand.u32 (!%p136_p5), 1, %s461_s7  }
  0x31   : > { %139 = sbr.rel (%p136_p5) target bundleno = 84 (0x54), region = 24  ;;  %s291_s25 = sshll.u32 (!%p136_p5), %s604_s24, 3 }
  0x32   : > { %s142_s26 = scalar_lea.sflag (!%p136_p5), [#allocation3], %s604_s24  ;;  %s145_s28 = scalar_lea.vmem (!%p136_p5), [#allocation2], %s291_s25 }
  0x38   : > { %448 = dma.done.wait (%p540_p8), %s142_s26, 128  }
  0x39   : > { %450 = vsyncadd (%p540_p8), %s142_s26, 4294967168  ;;  %s292_s27 = sshll.u32 %s604_s24, 4  ;;  %s300_s2 = sshll.u32 %s469_s9, 8  ;;  %v166_v0 = vld [vmem:[%s145_s28] sm:$0xff] }
  0x3a   : > { %s163_s29 = scalar_lea.vmem [#allocation5], %s292_s27  ;;  %s619_s5 = scalar_lea.hbm %s669_s1, %s300_s2  ;;  %v168_v1 = vsub.f32 1.0, %v166_v0 }
  0x3b   : > { %s189_s30 = sshll.u32 %s163_s29, 4  ;;  %167 = vst [vmem:[%s163_s29] sm:$0xff] %v166_v0  ;;  %s172_s18 = scalar_lea.sflag [#allocation4], %s604_s24  ;;  %s614_s30 = int_to_ptr.vmem [resolvable:$true] %s189_s30 }
  0x3c   : > { %293 = vst [vmem:[%s163_s29 + $0x8] sm:$0xff] %v168_v1  ;;  %s395_s12 = scalar_lea.vmem %s614_s30, 256  ;;  %p678_p9 = scmp.ne.s32.totalorder %s673_s19, 0 }
  0x3d   : > { %p396_p8 = scmp.ne.s32.totalorder %s614_s30, %s395_s12  ;;  %s480_s9 = smov [#allocation5]  }
  0x3e   : > { %s399_s13 = sshll.u32 %s480_s9, 4  ;;  %s400_s13 = int_to_ptr.vmem [resolvable:$false] %s399_s13 }
  0x3f   : > { %p397_p11 = pnand %p396_p8, %p678_p9  ;;  %s401_s15 = scalar_lea.vmem %s400_s13, 512 }
  0x40   : > { %p402_p7 = scmp.lt.s32.totalorder %s614_s30, %s400_s13  ;;  %p403_p13 = scmp.lt.s32.totalorder %s401_s15, %s395_s12 }
  0x41   : > { %p398_p0 = pneg %p397_p11 }
  0x42   : > { %p404_p3 = por %p403_p13, %p402_p7 }
  0x44   : > { %p405_p6 = pnand %p404_p3, %p398_p0 }
  0x46   : > { %408 = shalt.err (!%p405_p6)
}
  0x47   : > { %s409_s16 = scalar_lea.hbm %s619_s5, 256  ;;  %s413_s23 = scalar_lea.hbm %s669_s1, 512 }
  0x48   : > { %p410_p4 = scmp.ne.s32.totalorder %s619_s5, %s409_s16  ;;  %p414_p1 = scmp.lt.u32.totalorder %s619_s5, %s669_s1 }
  0x49   : > { %p415_p2 = scmp.lt.u32.totalorder %s413_s23, %s409_s16  ;;  %p417_p8 = scmp.lt.u32.totalorder %s409_s16, %s619_s5 }
  0x4a   : > { %p411_p10 = pnand %p410_p4, %p678_p9 }
  0x4b   : > { %p416_p5 = por %p415_p2, %p414_p1 }
  0x4c   : > { %p412_p12 = pneg %p411_p10 }
  0x4d   : > { %p418_p11 = por %p417_p8, %p416_p5 }
  0x4f   : > { %p419_p0 = pnand %p418_p11, %p412_p12 }
  0x51   : > { %422 = shalt.err (!%p419_p0)
}
  0x52   : > { %s481_s28 = smov 128   ;;  %s482_s27 = smov 8  }
  0x53   : > { %303 = dma.vmem_to_hbm [thread:$0]  (%p678_p9), %s614_s30, 256, %s619_s5, %s172_s18, %s481_s28, %s481_s28, %s482_s27  }
  0x54 PF: > { %s204_s29 = sand.u32 1, %s457_s6   ;;  %p679_p7 = scmp.ne.s32.totalorder %s674_s21, 0 }
  0x55   : > { %p680_p13 = scmp.ge.s32.totalorder %s477_s11, 2  ;;  %s205_s2 = scalar_lea.sflag [#allocation4], %s204_s29 }
  0x57   : > { %p310_p3 = pnand %p680_p13, %p679_p7 }
  0x59   : > { %452 = dma.done.wait (!%p310_p3), %s205_s2, 256  }
  0x5a   : > { %454 = vsyncadd (!%p310_p3), %s205_s2, 4294967040  ;;  %s17_s11 = sadd.s32 1, %s477_s11   ;;  %s681_s6 = smov %s461_s7 }
  0x5b   : > { %p14_p6 = scmp.ge.s32.totalorder %s17_s11, 4   ;;  %s682_s7 = smov %s465_s8 }
  0x5c   : > { %s683_s8 = smov %s549_s20  ;;  %s684_s9 = smov %s473_s10 }
  0x5d   : > { %s685_s10 = smov %s687_s14  ;;  %16 = sbr.rel (!%p14_p6) target bundleno = 6 (0x6), region = 70 }
  0x64   :  { %210 = vsyncpa [#allocation3], 1 }
  0x65   :  { %212 = vsyncpa [#allocation3 + $0x1], 1 }
  0x66   :  { %213 = vsyncpa [#allocation4], 1 }
  0x67   :  { %215 = vsyncpa [#allocation4 + $0x1], 1 }

</bundles_post_ra>
